<compile_context>
chip_gen: v5e
topology: v5e:2x2
jax: 0.10.0
libtpu: 0.0.40
codegen_flags: <defaults>
</compile_context>

<pallas_src>
import math

import jax
import jax.numpy as jnp
from jax.experimental import pallas as pl
from jax.experimental.pallas import tpu as pltpu


# ---------------------------------------------------------------------------
# Hardware-aware VMEM budget
# ---------------------------------------------------------------------------
def _vmem_budget_bytes():
    """~80% of the physical per-core VMEM (64 MiB on v7x, 128 MiB on v5e/v6e),
    leaving headroom for compiler scratch / semaphores / metadata."""
    try:
        cap = int(pltpu.get_tpu_info().vmem_capacity_bytes)
    except Exception:
        cap = 64 << 20  # conservative (v7x-sized) fallback
    return max(int(cap * 0.80), 24 << 20)


def _round_up(x, m):
    return (x + m - 1) // m * m


def _tile_candidates(dim):
    """128-multiples that exactly divide `dim`, descending. `dim` must itself
    be a multiple of 128 (we pad in the wrapper), so 128 is always included."""
    return [t for t in range(dim, 0, -128) if dim % t == 0]


# ---------------------------------------------------------------------------
# Kernels
# ---------------------------------------------------------------------------
def soft_embed_kernel(x_ref, emb_ref, out_ref, acc_ref):
    # x_ref: (tm, tk), emb_ref: (tk, tn), out_ref: (tm, tn), acc_ref: (tm, tn) f32
    @pl.when(pl.program_id(2) == 0)
    def _init():
        acc_ref[...] = jnp.zeros_like(acc_ref)

    acc_ref[...] += jnp.dot(
        x_ref[...], emb_ref[...], preferred_element_type=jnp.float32
    )

    @pl.when(pl.program_id(2) == pl.num_programs(2) - 1)
    def _finalize():
        out_ref[...] = acc_ref[...].astype(out_ref.dtype)


def gather_vmem_kernel(ids_ref, emb_ref, out_ref):
    # Small-table fast path: the whole table lives in VMEM (fetched once,
    # constant block index), rows are copied on-chip.
    # ids_ref: (N_pad,) int32 in SMEM; emb_ref: (V, D); out_ref: (G, D)
    g_rows = out_ref.shape[0]
    base = pl.program_id(0) * g_rows

    @pl.loop(0, g_rows)
    def _(g):
        out_ref[pl.ds(g, 1), :] = emb_ref[pl.ds(ids_ref[base + g], 1), :]


def gather_dma_kernel(ids_ref, emb_hbm, out_ref, buf, sems):
    # Large-table path: per-row HBM DMAs, double-buffered across grid steps.
    # ids_ref: (N_pad,) int32 in SMEM (scalar prefetch)
    # emb_hbm: (V, D) table left in HBM (memory_space=pl.ANY)
    # out_ref: (G, D); buf: (2, G, D) VMEM; sems: (2, G) DMA semaphores
    g_rows = out_ref.shape[0]
    step = pl.program_id(0)
    n_steps = pl.num_programs(0)
    slot = step & 1

    def row_copy(block, slot_, g):
        idx = ids_ref[block * g_rows + g]
        return pltpu.make_async_copy(
            emb_hbm.at[pl.ds(idx, 1)],
            buf.at[slot_, pl.ds(g, 1)],
            sems.at[slot_, g],
        )

    def issue_block(block, slot_):
        @pl.loop(0, g_rows)
        def _(g):
            row_copy(block, slot_, g).start()

    # Prime the pipeline on the first step, then keep the next block in flight.
    @pl.when(step == 0)
    def _prime():
        issue_block(0, 0)

    @pl.when(step + 1 < n_steps)
    def _prefetch():
        issue_block(step + 1, (step + 1) & 1)

    # Wait for the current block (same ids_ref-based descriptors as started).
    @pl.loop(0, g_rows)
    def _(g):
        row_copy(step, slot, g).wait()

    out_ref[...] = buf[slot]


# ---------------------------------------------------------------------------
# Soft path
# ---------------------------------------------------------------------------
def _choose_soft_tiles(N, V_pad, D_pad, x_b, e_b, o_b, budget):
    """Pick (tm, tn, tk), maximizing tn first (x is re-read D/tn times from
    HBM), then tm (emb re-reads), then tk (fewer grid steps)."""
    tn_cands = _tile_candidates(D_pad)
    tk_cands = _tile_candidates(V_pad)
    tm_cap = min(512, _round_up(N, 8))
    tm_cands = [t for t in (512, 256, 128) if t <= tm_cap] or [tm_cap]

    def footprint(tm, tn, tk):
        # double-buffered input/output tiles + f32 accumulator
        return 2 * (tm * tk * x_b + tk * tn * e_b + tm * tn * o_b) + tm * tn * 4

    for tn in tn_cands:
        for tm in tm_cands:
            for tk in tk_cands:
                if footprint(tm, tn, tk) <= budget:
                    return tm, tn, tk
    return tm_cands[-1], tn_cands[-1], tk_cands[-1]


def _soft_embed(x, embedding, compute_dtype=None):
    B, S, V = x.shape
    D = embedding.shape[1]
    N = B * S

    out_dtype = jnp.promote_types(x.dtype, embedding.dtype)
    if compute_dtype is not None:
        x = x.astype(compute_dtype)
        embedding = embedding.astype(compute_dtype)

    xf = x.reshape(N, V)

    # Pad the contracted (V) and output (D) dims to 128-multiples: zero
    # rows/cols contribute nothing, tiles stay (8,128)-aligned and bounded.
    V_pad = _round_up(V, 128)
    D_pad = _round_up(D, 128)
    if V_pad != V:
        xf = jnp.pad(xf, ((0, 0), (0, V_pad - V)))
    if V_pad != V or D_pad != D:
        embedding = jnp.pad(embedding, ((0, V_pad - V), (0, D_pad - D)))

    x_b = jnp.dtype(xf.dtype).itemsize
    e_b = jnp.dtype(embedding.dtype).itemsize
    o_b = jnp.dtype(out_dtype).itemsize

    budget = _vmem_budget_bytes()
    tm, tn, tk = _choose_soft_tiles(N, V_pad, D_pad, x_b, e_b, o_b, budget)

    # v7x has 2 TensorCores sharding the "parallel" axes: avoid a degenerate
    # 1x1xK grid by splitting the D axis when both parallel axes are size 1.
    if pl.cdiv(N, tm) == 1 and D_pad // tn == 1:
        smaller = [t for t in _tile_candidates(D_pad) if t < tn]
        if smaller:
            tn = smaller[0]

    grid = (pl.cdiv(N, tm), D_pad // tn, V_pad // tk)

    need = 2 * (tm * tk * x_b + tk * tn * e_b + tm * tn * o_b) + tm * tn * 4
    vmem_limit = int(max(need + (8 << 20), 32 << 20))

    out = pl.pallas_call(
        soft_embed_kernel,
        out_shape=jax.ShapeDtypeStruct((N, D_pad), out_dtype),
        grid=grid,
        in_specs=[
            pl.BlockSpec((tm, tk), lambda i, j, k: (i, k)),
            pl.BlockSpec((tk, tn), lambda i, j, k: (k, j)),
        ],
        out_specs=pl.BlockSpec((tm, tn), lambda i, j, k: (i, j)),
        scratch_shapes=[pltpu.VMEM((tm, tn), jnp.float32)],
        compiler_params=pltpu.CompilerParams(
            dimension_semantics=("parallel", "parallel", "arbitrary"),
            vmem_limit_bytes=vmem_limit,
        ),
    )(xf, embedding)

    if D_pad != D:
        out = out[:, :D]
    return out.reshape(B, S, D)


# ---------------------------------------------------------------------------
# Lookup path
# ---------------------------------------------------------------------------
def _gather_embed(x, embedding, vmem_table_max_bytes=None):
    V, D = embedding.shape
    orig_shape = x.shape
    e_b = jnp.dtype(embedding.dtype).itemsize

    # Clamp out-of-range ids (torch nn.Embedding would raise; we stay in-bounds
    # so the row fetch never goes OOB).
    ids = jnp.clip(x.reshape(-1).astype(jnp.int32), 0, V - 1)
    N = ids.shape[0]

    budget = _vmem_budget_bytes()

    # Rows gathered per grid step: large enough to amortize the ~0.35us/step
    # overhead and keep many row DMAs in flight; bounded to ~2 MiB of rows.
    G = min(256, _round_up(N, 8))
    G = max(8, min(G, max(8, ((1 << 21) // max(D * e_b, 1)) // 8 * 8)))
    n_blocks = pl.cdiv(N, G)
    pad = n_blocks * G - N
    if pad:
        # Only the tiny 1-D id vector is padded; padded rows are masked writes.
        ids = jnp.concatenate([ids, jnp.zeros((pad,), jnp.int32)], axis=0)

    table_bytes = V * D * e_b
    if vmem_table_max_bytes is None:
        vmem_table_max_bytes = min(budget // 4, 16 << 20)

    if table_bytes <= vmem_table_max_bytes:
        # Fast path: keep the whole table in VMEM (fetched once), on-chip copy.
        grid_spec = pltpu.PrefetchScalarGridSpec(
            num_scalar_prefetch=1,
            grid=(n_blocks,),
            in_specs=[pl.BlockSpec((V, D), lambda i, ids: (0, 0))],
            out_specs=pl.BlockSpec((G, D), lambda i, ids: (i, 0)),
        )
        kernel = gather_vmem_kernel
        params = pltpu.CompilerParams(
            dimension_semantics=("parallel",),  # independent blocks: v7x 2 TCs
            vmem_limit_bytes=int(
                max(2 * table_bytes + 4 * G * D * e_b + (4 << 20), 32 << 20)
            ),
        )
    else:
        # Large tables: HBM row gather, double-buffered across grid steps.
        grid_spec = pltpu.PrefetchScalarGridSpec(
            num_scalar_prefetch=1,
            grid=(n_blocks,),
            in_specs=[pl.BlockSpec(memory_space=pl.ANY)],  # table stays in HBM
            out_specs=pl.BlockSpec((G, D), lambda i, ids: (i, 0)),
            scratch_shapes=[
                pltpu.VMEM((2, G, D), embedding.dtype),
                pltpu.SemaphoreType.DMA((2, G)),
            ],
        )
        kernel = gather_dma_kernel
        # Cross-step double buffering carries state between steps -> arbitrary.
        params = pltpu.CompilerParams(
            dimension_semantics=("arbitrary",),
            vmem_limit_bytes=int(max(4 * G * D * e_b + (8 << 20), 32 << 20)),
        )

    out = pl.pallas_call(
        kernel,
        grid_spec=grid_spec,
        out_shape=jax.ShapeDtypeStruct((N, D), embedding.dtype),
        compiler_params=params,
    )(ids, embedding)
    return out.reshape(*orig_shape, D)


# ---------------------------------------------------------------------------
# Wrapper (mirrors EmbeddingLayer.forward)
# ---------------------------------------------------------------------------
def embedding_layer_forward(x, embedding, *, compute_dtype=None,
                            vmem_table_max_bytes=None):
    """embedding: (vocab_dim, dim).  x either (B, S, vocab_dim) float (soft
    path, einsum 'b s v, v d -> b s d') or integer indices (embedding[x]).
    compute_dtype=jnp.bfloat16 runs the soft matmul in bf16 with an f32
    accumulator (faster MXU / half the DMA bytes; precision tradeoff)."""
    V, D = embedding.shape
    if x.ndim == 3 and x.shape[-1] == V:
        return _soft_embed(x, embedding, compute_dtype=compute_dtype)
    return _gather_embed(x, embedding, vmem_table_max_bytes=vmem_table_max_bytes)


# ---------------------------------------------------------------------------
# Deterministic parameter init (kaiming_uniform_, a=sqrt(5))
# ---------------------------------------------------------------------------
def init_embedding(key, vocab_dim, dim):
    # torch kaiming_uniform with a=sqrt(5): bound = 1/sqrt(fan_in), fan_in = dim
    bound = 1.0 / math.sqrt(dim)
    return jax.random.uniform(
        key, (vocab_dim, dim), dtype=jnp.float32, minval=-bound, maxval=bound
    )


if __name__ == "__main__":
    key = jax.random.PRNGKey(0)
    k_emb, k_soft, k_ids, k_emb2, k_soft2 = jax.random.split(key, 5)

    # --- small shapes (single-block grid, padded V/D) ------------------------
    B, S, V, D = 2, 8, 32, 32
    embedding = init_embedding(k_emb, V, D)

    x_soft = jax.random.uniform(k_soft, (B, S, V), dtype=jnp.float32)
    out_soft = embedding_layer_forward(x_soft, embedding)
    jax.block_until_ready(out_soft)
    ref_soft = jnp.einsum(
        "bsv,vd->bsd", x_soft, embedding, precision=jax.lax.Precision.HIGHEST
    )
    assert out_soft.shape == (B, S, D)
    assert jnp.allclose(out_soft, ref_soft, atol=1e-4, rtol=1e-4)

    x_ids = jax.random.randint(k_ids, (B, S), 0, V, dtype=jnp.int32)
    out_gather = embedding_layer_forward(x_ids, embedding)      # VMEM-table path
    jax.block_until_ready(out_gather)
    ref_gather = embedding[x_ids]
    assert out_gather.shape == (B, S, D)
    assert jnp.allclose(out_gather, ref_gather, atol=1e-6, rtol=1e-6)

    out_gather_dma = embedding_layer_forward(                   # force DMA path
        x_ids, embedding, vmem_table_max_bytes=0
    )
    jax.block_until_ready(out_gather_dma)
    assert jnp.allclose(out_gather_dma, ref_gather, atol=1e-6, rtol=1e-6)

    # --- modest shapes exercising M/K tiling + ragged last M block -----------
    B2, S2, V2, D2 = 2, 136, 1024, 256       # N=272: 2 M-blocks (ragged tail)
    embedding2 = init_embedding(k_emb2, V2, D2)
    x_soft2 = jax.random.uniform(k_soft2, (B2, S2, V2), dtype=jnp.float32)
    out_soft2 = embedding_layer_forward(x_soft2, embedding2)
    jax.block_until_ready(out_soft2)
    ref_soft2 = jnp.einsum(
        "bsv,vd->bsd", x_soft2, embedding2, precision=jax.lax.Precision.HIGHEST
    )
    assert out_soft2.shape == (B2, S2, D2)
    assert jnp.allclose(out_soft2, ref_soft2, atol=1e-2, rtol=1e-2)

    # optional bf16 compute flag (looser tolerance)
    out_soft_bf16 = embedding_layer_forward(
        x_soft, embedding, compute_dtype=jnp.bfloat16
    )
    jax.block_until_ready(out_soft_bf16)
    assert jnp.allclose(out_soft_bf16, ref_soft, atol=3e-2, rtol=3e-2)

    # lookup path: multi-block ragged gather on both sub-paths
    x_ids2 = jax.random.randint(k_ids, (B2, S2), 0, V2, dtype=jnp.int32)
    ref_gather2 = embedding2[x_ids2]
    out_gather2 = embedding_layer_forward(x_ids2, embedding2)   # VMEM-table path
    jax.block_until_ready(out_gather2)
    assert jnp.allclose(out_gather2, ref_gather2, atol=1e-6, rtol=1e-6)
    out_gather2_dma = embedding_layer_forward(                  # force DMA path
        x_ids2, embedding2, vmem_table_max_bytes=0
    )
    jax.block_until_ready(out_gather2_dma)
    assert jnp.allclose(out_gather2_dma, ref_gather2, atol=1e-6, rtol=1e-6)

    print("KERNEL_OK")
</pallas_src>

<mosaic_0001>
module attributes {stable_mosaic.version = 11 : i64} {
  func.func @soft_embed_kernel(%arg0: i32, %arg1: i32, %arg2: i32, %arg3: memref<16x128xf32, #tpu.memory_space<vmem>>, %arg4: memref<128x128xf32, #tpu.memory_space<vmem>>, %arg5: memref<16x128xf32, #tpu.memory_space<vmem>>, %arg6: memref<16x128xf32, #tpu.memory_space<vmem>>) attributes {dimension_semantics = [#tpu.dimension_semantics<parallel>, #tpu.dimension_semantics<parallel>, #tpu.dimension_semantics<arbitrary>], iteration_bounds = array<i64: 1, 1, 1>, scalar_prefetch = 0 : i64, scratch_operands = 1 : i64, tpu.core_type = #tpu.core_type<tc>, window_params = [{transform_indices = @transform_0, window_bounds = array<i64: 16, 128>}, {transform_indices = @transform_1, window_bounds = array<i64: 128, 128>}, {transform_indices = @transform_2, window_bounds = array<i64: 16, 128>}]} {
    %c0_i32 = arith.constant 0 : i32
    %0 = arith.cmpi eq, %arg2, %c0_i32 : i32
    %1 = arith.extui %0 : i1 to i32
    %c0_i32_0 = arith.constant 0 : i32
    %2 = arith.cmpi ne, %1, %c0_i32_0 : i32
    scf.if %2 {
      %cst_10 = arith.constant 0.000000e+00 : f32
      %12 = vector.broadcast %cst_10 : f32 to vector<16x128xf32>
      %c0_11 = arith.constant 0 : index
      %c0_12 = arith.constant 0 : index
      %13 = vector.load %arg6[%c0_11, %c0_12] : memref<16x128xf32, #tpu.memory_space<vmem>>, vector<16x128xf32>
      tpu.vector_store %arg6[%c0_11, %c0_12], %12 {strides = array<i32>} : memref<16x128xf32, #tpu.memory_space<vmem>>, vector<16x128xf32>,
    } else {
    }
    %c0 = arith.constant 0 : index
    %c0_1 = arith.constant 0 : index
    %3 = vector.load %arg6[%c0, %c0_1] : memref<16x128xf32, #tpu.memory_space<vmem>>, vector<16x128xf32>
    %c0_2 = arith.constant 0 : index
    %c0_3 = arith.constant 0 : index
    %4 = vector.load %arg3[%c0_2, %c0_3] : memref<16x128xf32, #tpu.memory_space<vmem>>, vector<16x128xf32>
    %c0_4 = arith.constant 0 : index
    %c0_5 = arith.constant 0 : index
    %5 = vector.load %arg4[%c0_4, %c0_5] : memref<128x128xf32, #tpu.memory_space<vmem>>, vector<128x128xf32>
    %cst = arith.constant dense<0.000000e+00> : vector<16x128xf32>
    %6 = tpu.matmul %4, %5, %cst {dimension_numbers = #tpu.dot_dimension_numbers<[1], [0], [0], [1], [0, 0, 1, 1], [], []>} : vector<16x128xf32>, vector<128x128xf32>, vector<16x128xf32> -> vector<16x128xf32>
    %7 = arith.addf %3, %6 : vector<16x128xf32>
    %c0_6 = arith.constant 0 : index
    %c0_7 = arith.constant 0 : index
    %8 = vector.load %arg6[%c0_6, %c0_7] : memref<16x128xf32, #tpu.memory_space<vmem>>, vector<16x128xf32>
    tpu.vector_store %arg6[%c0_6, %c0_7], %7 {strides = array<i32>} : memref<16x128xf32, #tpu.memory_space<vmem>>, vector<16x128xf32>,
    %c0_i32_8 = arith.constant 0 : i32
    %9 = arith.cmpi eq, %arg2, %c0_i32_8 : i32
    %10 = arith.extui %9 : i1 to i32
    %c0_i32_9 = arith.constant 0 : i32
    %11 = arith.cmpi ne, %10, %c0_i32_9 : i32
    scf.if %11 {
      %c0_10 = arith.constant 0 : index
      %c0_11 = arith.constant 0 : index
      %12 = vector.load %arg6[%c0_10, %c0_11] : memref<16x128xf32, #tpu.memory_space<vmem>>, vector<16x128xf32>
      %c0_12 = arith.constant 0 : index
      %c0_13 = arith.constant 0 : index
      %13 = vector.load %arg5[%c0_12, %c0_13] : memref<16x128xf32, #tpu.memory_space<vmem>>, vector<16x128xf32>
      tpu.vector_store %arg5[%c0_12, %c0_13], %12 {strides = array<i32>} : memref<16x128xf32, #tpu.memory_space<vmem>>, vector<16x128xf32>,
    } else {
    }
    return
  }
  func.func @transform_0(%arg0: i32, %arg1: i32, %arg2: i32) -> (i32, i32) {
    %c0_i32 = arith.constant 0 : i32
    return %arg0, %arg2 : i32, i32
  }
  func.func @transform_1(%arg0: i32, %arg1: i32, %arg2: i32) -> (i32, i32) {
    %c0_i32 = arith.constant 0 : i32
    return %arg2, %arg1 : i32, i32
  }
  func.func @transform_2(%arg0: i32, %arg1: i32, %arg2: i32) -> (i32, i32) {
    %c0_i32 = arith.constant 0 : i32
    return %arg0, %arg1 : i32, i32
  }
}

</mosaic_0001>

<bundles_post_ra>
// kernel: tpu_custom_call.1
= control target key start
LH: loop header
LB: loop body
LE: loop exit
PB: predicated region body
PF: predicated region fallthrough
CT: control target
= control target key end

     0   :  { %7 = vsyncpa [#allocation4], 0  ;;  %s261_s0 = inlined_call_operand.hbm [shape: f32[16,128], index: 0, kind: input, shape index: {}]   ;;  %s262_s1 = inlined_call_operand.hbm [shape: f32[128,128], index: 1, kind: input, shape index: {}]   ;;  %s263_s2 = inlined_call_operand.hbm [shape: f32[16,128], index: 2, kind: output, shape index: {}]  }
   0x1   :  { %8 = vsyncpa [#allocation7], 0 }
   0x2   :  { %9 = vsyncpa [#allocation5], 0  ;;  %s14_s11 = sshll.u32 %s261_s0, 4  ;;  %s223_s12 = smov [#allocation3]   ;;  %s15_s11 = int_to_ptr.hbm [resolvable:$true] %s14_s11 }
   0x3   :  { %s16_s13 = sshll.u32 %s223_s12, 4  ;;  %s27_s16 = sshll.u32 %s262_s1, 4  ;;  %s17_s13 = int_to_ptr.vmem [resolvable:$true] %s16_s13  ;;  %s28_s16 = int_to_ptr.hbm [resolvable:$true] %s27_s16 }
   0x4   :  { %s224_s17 = smov 128   ;;  %s225_s18 = smov 8  }
   0x5   :  { %22 = dma.hbm_to_vmem [thread:$0]  %s15_s11, 256, %s17_s13, [#allocation4], %s224_s17, %s224_s17, %s225_s18  }
   0x6   :  { %s226_s19 = smov [#allocation6]  }
   0x7   :  { %s29_s20 = sshll.u32 %s226_s19, 4  ;;  %s30_s20 = int_to_ptr.vmem [resolvable:$true] %s29_s20 }
   0x8   :  { %35 = dma.hbm_to_vmem [thread:$0]  %s28_s16, 2048, %s30_s20, [#allocation7], %s224_s17, %s224_s17, %s225_s18  }
   0x9   :  { %217 = dma.done.wait [#allocation4], 256  }
   0xa   :  { %218 = vsyncadd [#allocation4], 4294967040 }
   0xb   :  { %219 = dma.done.wait [#allocation7], 2048  }
   0xc   :  { %220 = vsyncadd [#allocation7], 4294965248  ;;  %v69_v0 = vld [vmem:[#allocation6 + $0x78] sm:$0xff]  ;;  %v68_v1 = vld [vmem:[#allocation6 + $0x70] sm:$0xff]  ;;  %s227_s0 = smov [#allocation8]   ;;  %s110_s23 = sshll.u32 %s263_s2, 4  ;;  %s111_s23 = int_to_ptr.hbm [resolvable:$true] %s110_s23 }
   0xd   :  { %70 = vmatpush.msra.mxu0 %v69_v0  ;;  %124 = vmatpush.msra.mxu1 %v69_v0  ;;  %v67_v2 = vld [vmem:[#allocation6 + $0x68] sm:$0xff]  ;;  %v66_v3 = vld [vmem:[#allocation6 + $0x60] sm:$0xff]  ;;  %v65_v4 = vld [vmem:[#allocation6 + $0x58] sm:$0xff]  ;;  %s108_s1 = sshll.u32 %s227_s0, 4  ;;  %s109_s1 = int_to_ptr.vmem [resolvable:$true] %s108_s1 }
   0xe   :  { %v64_v5 = vld [vmem:[#allocation6 + $0x50] sm:$0xff]  ;;  %v63_v6 = vld [vmem:[#allocation6 + $0x48] sm:$0xff]  ;;  %v62_v7 = vld [vmem:[#allocation6 + $0x40] sm:$0xff] }
   0xf   :  { %71 = vmatpush.msra.mxu0 %v68_v1  ;;  %125 = vmatpush.msra.mxu1 %v68_v1  ;;  %v61_v8 = vld [vmem:[#allocation6 + $0x38] sm:$0xff]  ;;  %v60_v9 = vld [vmem:[#allocation6 + $0x30] sm:$0xff]  ;;  %v59_v10 = vld [vmem:[#allocation6 + $0x28] sm:$0xff] }
  0x10   :  { %v58_v11 = vld [vmem:[#allocation6 + $0x20] sm:$0xff]  ;;  %v57_v12 = vld [vmem:[#allocation6 + $0x18] sm:$0xff]  ;;  %v56_v13 = vld [vmem:[#allocation6 + $0x10] sm:$0xff] }
  0x11   :  { %72 = vmatpush.msra.mxu0 %v67_v2  ;;  %126 = vmatpush.msra.mxu1 %v67_v2  ;;  %v55_v14 = vld [vmem:[#allocation6 + $0x8] sm:$0xff]  ;;  %v54_v15 = vld [vmem:[#allocation6] sm:$0xff]  ;;  %v52_v16 = vld [vmem:[#allocation3] sm:$0xff] }
  0x12   :  { %v53_v17 = vld [vmem:[#allocation3 + $0x8] sm:$0xff] }
  0x13   :  { %73 = vmatpush.msra.mxu0 %v66_v3  ;;  %127 = vmatpush.msra.mxu1 %v66_v3 }
  0x15   :  { %74 = vmatpush.msra.mxu0 %v65_v4  ;;  %128 = vmatpush.msra.mxu1 %v65_v4 }
  0x17   :  { %75 = vmatpush.msra.mxu0 %v64_v5  ;;  %129 = vmatpush.msra.mxu1 %v64_v5 }
  0x19   :  { %76 = vmatpush.msra.mxu0 %v63_v6  ;;  %130 = vmatpush.msra.mxu1 %v63_v6 }
  0x1b   :  { %77 = vmatpush.msra.mxu0 %v62_v7  ;;  %131 = vmatpush.msra.mxu1 %v62_v7 }
  0x1d   :  { %78 = vmatpush.msra.mxu0 %v61_v8  ;;  %132 = vmatpush.msra.mxu1 %v61_v8 }
  0x1f   :  { %79 = vmatpush.msra.mxu0 %v60_v9  ;;  %133 = vmatpush.msra.mxu1 %v60_v9 }
  0x21   :  { %80 = vmatpush.msra.mxu0 %v59_v10  ;;  %134 = vmatpush.msra.mxu1 %v59_v10 }
  0x23   :  { %81 = vmatpush.msra.mxu0 %v58_v11  ;;  %135 = vmatpush.msra.mxu1 %v58_v11 }
  0x25   :  { %82 = vmatpush.msra.mxu0 %v57_v12  ;;  %136 = vmatpush.msra.mxu1 %v57_v12 }
  0x27   :  { %83 = vmatpush.msra.mxu0 %v56_v13  ;;  %137 = vmatpush.msra.mxu1 %v56_v13 }
  0x29   :  { %84 = vmatpush.msra.mxu0 %v55_v14  ;;  %138 = vmatpush.msra.mxu1 %v55_v14 }
  0x2b   :  { %85 = vmatpush.msra.mxu0 %v54_v15  ;;  %139 = vmatpush.msra.mxu1 %v54_v15 }
  0x2c   :  { %86 = vmatmul.f32.vlgmr.msra.gmra.mxu0 %v52_v16  ;;  %89 = vmatmul.f32.vlgmr.msra.gmra.mxu1 %v53_v17 }
  0xa9   :  { %v87_v18 = vpop.f32.mrf.mxu0  ;;  %v90_v19 = vpop.f32.mrf.mxu1 }
  0xaa   :  { %102 = vst [vmem:[#allocation8] sm:$0xff] %v87_v18 }
  0xab   :  { %103 = vst [vmem:[#allocation8 + $0x8] sm:$0xff] %v90_v19 }
  0xac   :  { %116 = dma.vmem_to_hbm [thread:$0]  %s109_s1, 256, %s111_s23, [#allocation5], %s224_s17, %s224_s17, %s225_s18  }
  0xad   :  { %221 = dma.done.wait [#allocation5], 256  }
  0xae   :  { %222 = vsyncadd [#allocation5], 4294967040 }
  0xaf   :  { %121 = vsyncpa [#allocation4], 1 }
  0xb0   :  { %122 = vsyncpa [#allocation7], 1 }
  0xb1   :  { %123 = vsyncpa [#allocation5], 1 }

</bundles_post_ra>
